<compile_context>
chip_gen: v5e
topology: v5e:2x2
jax: 0.10.0
libtpu: 0.0.40
codegen_flags: <defaults>
</compile_context>

<pallas_src>
from functools import partial

import jax
import jax.numpy as jnp
from jax.experimental import pallas as pl
from jax.experimental.pallas import tpu as pltpu


def _round_up(v, m):
    return ((v + m - 1) // m) * m


def _choose_lane_tile(HW, C, Cout, in_bytes, out_bytes, n_batch,
                      budget_bytes=10 << 20, t_max=8192):
    """Pick lane-tile width t (multiple of 128) and padded lane extent hwp.

    Budget covers the double-buffered (C,t) input and (Cout,t) output tiles so
    the pipeline stays well under the default scoped VMEM limit on every
    generation (incl. v7x's 64 MiB physical VMEM per TC).
    """
    per_lane = 2 * (C * in_bytes + Cout * out_bytes)      # dbl-buffered in+out
    t_budget = max((budget_bytes // per_lane) // 128 * 128, 128)
    t_budget = min(t_budget, t_max)
    hw128 = _round_up(HW, 128)
    if hw128 <= t_budget:
        # Whole plane fits in one tile.  If the batch alone can't feed two
        # TensorCores (v7x megacore), split the lane axis into two tiles.
        n_tiles = 2 if (n_batch < 2 and hw128 >= 256) else 1
        t = _round_up(-(-hw128 // n_tiles), 128)
    else:
        t = t_budget
    hwp = _round_up(HW, t)
    return t, hwp


def _sepconv_kernel(x_ref, w_ref, b_ref, o_ref):
    # x_ref: (C, t)  w_ref: (Cout, C)  b_ref: (Cout, 1) f32  o_ref: (Cout, t)
    acc = jnp.dot(w_ref[...], x_ref[...], preferred_element_type=jnp.float32)
    o_ref[...] = (acc + b_ref[...]).astype(o_ref.dtype)


@partial(jax.jit, static_argnames=("padding", "eps", "compute_dtype", "out_dtype"))
def separable_conv2d(x, w_dw, gamma, beta, w_pw, *, padding=1, eps=1e-5,
                     compute_dtype=jnp.bfloat16, out_dtype=jnp.float32):
    """x: (N, C, H, W) NCHW.  w_dw: (C,1,1,1).  w_pw: (Cout,C,1,1).

    Specialized to the module defaults kernel_size=1, stride=1, dilation=1,
    bias=False: the depthwise/BN fold and the border==bias identity rely on it.
    # TODO(synk): on v5e pass out_dtype=jnp.bfloat16 if the consumer tolerates
    # it (halves the writeback stream, the binding path on v5e).
    """
    N, C, H, W = x.shape
    Cout = w_pw.shape[0]
    assert w_dw.shape == (C, 1, 1, 1), w_dw.shape       # depthwise 1x1, groups=C
    assert w_pw.shape == (Cout, C, 1, 1), w_pw.shape    # pointwise 1x1
    Ho, Wo = H + 2 * padding, W + 2 * padding
    HW = H * W

    xf = x.astype(jnp.float32)
    dw = w_dw.reshape(C).astype(jnp.float32)

    # Training-mode BatchNorm2d statistics of the zero-padded depthwise output,
    # computed analytically from the UNPADDED x (zero padding leaves the
    # per-channel sums unchanged; only the element count grows H*W -> Ho*Wo).
    # Centered variance (per review) instead of E[x^2]-E[x]^2 for precision.
    # TODO(synk): at production scale fold this stats pass into the producer of
    # x (or compute sum/sumsq in a single fused reduction) to save an HBM pass.
    r = (H * W) / float(Ho * Wo)
    mx = jnp.mean(xf, axis=(0, 2, 3))                   # unpadded per-channel mean
    vx = jnp.var(xf, axis=(0, 2, 3))                    # unpadded biased variance
    mean_pad = dw * (r * mx)                            # E[dw * x_pad]
    var_pad = (dw * dw) * (r * (vx + (1.0 - r) * mx * mx))
    bn_scale = gamma.astype(jnp.float32) * jax.lax.rsqrt(var_pad + eps)
    eff_scale = dw * bn_scale                           # per-channel scale
    eff_shift = beta.astype(jnp.float32) - mean_pad * bn_scale

    # Fold the per-channel affine into the pointwise conv: out = W' @ x + bias.
    w_mat = w_pw.reshape(Cout, C).astype(jnp.float32)
    w_eff = (w_mat * eff_scale[None, :]).astype(compute_dtype)   # (Cout, C)
    bias = (w_mat @ eff_shift).reshape(Cout, 1)                  # (Cout, 1) f32

    # Channels-on-sublane / spatial-on-lane slab over the UNPADDED image.
    in_b = jnp.dtype(compute_dtype).itemsize
    out_b = jnp.dtype(out_dtype).itemsize
    t, hwp = _choose_lane_tile(HW, C, Cout, in_b, out_b, N)
    x_slab = xf.astype(compute_dtype).reshape(N, C, HW)
    if hwp != HW:   # single lane-axis pad (multiple of t); no spatial pad ever
        x_slab = jnp.pad(x_slab, ((0, 0), (0, 0), (0, hwp - HW)))

    grid = (N, hwp // t)
    vmem_need = (2 * (C * in_b + Cout * out_b) * t      # dbl-buffered act tiles
                 + 2 * (Cout * C * in_b + Cout * 4))    # resident weights + bias
    vmem_limit = int(min(max(2 * vmem_need, 16 << 20), 64 << 20))
    cost = pl.CostEstimate(
        flops=2 * N * hwp * C * Cout,
        transcendentals=0,
        bytes_accessed=(N * C * hwp * in_b + Cout * C * in_b + Cout * 4
                        + N * Cout * hwp * out_b),
    )

    # TODO(synk): only if profiling shows exposed input DMA at small C, set
    # pipeline_mode=pl.Buffered(3) on the activation spec (check v7x budget).
    out_slab = pl.pallas_call(
        _sepconv_kernel,
        out_shape=jax.ShapeDtypeStruct((N, Cout, hwp), out_dtype),
        grid=grid,
        in_specs=[
            pl.BlockSpec((None, C, t), lambda n, j: (n, 0, j)),   # activations
            pl.BlockSpec((Cout, C), lambda n, j: (0, 0)),         # folded weights
            pl.BlockSpec((Cout, 1), lambda n, j: (0, 0)),         # folded bias
        ],
        out_specs=pl.BlockSpec((None, Cout, t), lambda n, j: (n, 0, j)),
        compiler_params=pltpu.CompilerParams(
            dimension_semantics=("parallel", "parallel"),
            vmem_limit_bytes=vmem_limit),
        cost_estimate=cost,
    )(x_slab, w_eff, bias)

    interior = out_slab[:, :, :HW].reshape(N, Cout, H, W)
    if padding == 0:
        return interior
    # kernel_size=1 => every padded-border output pixel is exactly bias[o]:
    # assemble the padded result as a bias-filled canvas + interior insert.
    canvas = jnp.broadcast_to(bias.reshape(1, Cout, 1, 1),
                              (N, Cout, Ho, Wo)).astype(out_dtype)
    return jax.lax.dynamic_update_slice(canvas, interior,
                                        (0, 0, padding, padding))


def _reference(x, w_dw, gamma, beta, w_pw, padding=1, eps=1e-5):
    """Pure-JAX reference mirroring the PyTorch module forward."""
    dw = jax.lax.conv_general_dilated(
        x, w_dw, window_strides=(1, 1), padding=[(padding, padding)] * 2,
        dimension_numbers=("NCHW", "OIHW", "NCHW"),
        feature_group_count=x.shape[1])
    mean = dw.mean(axis=(0, 2, 3), keepdims=True)
    var = dw.var(axis=(0, 2, 3), keepdims=True)
    bn = (dw - mean) / jnp.sqrt(var + eps)
    bn = bn * gamma.reshape(1, -1, 1, 1) + beta.reshape(1, -1, 1, 1)
    return jax.lax.conv_general_dilated(
        bn, w_pw, window_strides=(1, 1), padding=[(0, 0)] * 2,
        dimension_numbers=("NCHW", "OIHW", "NCHW"))


if __name__ == "__main__":
    N, C, H, W = 2, 4, 16, 16
    Cout = 8

    key = jax.random.PRNGKey(0)
    x = jax.random.normal(key, (N, C, H, W), dtype=jnp.float32)

    # Deterministic parameter init (synthetic — shapes follow nn.Conv2d/BatchNorm2d).
    w_dw = (0.5 + 0.1 * jnp.arange(C, dtype=jnp.float32)).reshape(C, 1, 1, 1)
    gamma = 1.0 + 0.1 * jnp.arange(C, dtype=jnp.float32)
    beta = 0.05 * jnp.arange(C, dtype=jnp.float32)
    w_pw = (0.01 * (jnp.arange(Cout * C, dtype=jnp.float32) - Cout * C / 2.0)
            ).reshape(Cout, C, 1, 1)

    ref = _reference(x, w_dw, gamma, beta, w_pw)

    # f32 compute path: tight check of the folded depthwise/BN/pointwise math.
    out_f32 = jax.block_until_ready(
        separable_conv2d(x, w_dw, gamma, beta, w_pw, compute_dtype=jnp.float32))
    assert out_f32.shape == (N, Cout, H + 2, W + 2), out_f32.shape
    err_f32 = float(jnp.max(jnp.abs(out_f32 - ref)))
    assert jnp.allclose(out_f32, ref, atol=1e-4, rtol=1e-4), err_f32

    # Default bf16 compute path (halved kernel HBM read traffic): bf16 tolerance.
    out_bf16 = jax.block_until_ready(
        separable_conv2d(x, w_dw, gamma, beta, w_pw))
    assert out_bf16.shape == (N, Cout, H + 2, W + 2), out_bf16.shape
    err_bf16 = float(jnp.max(jnp.abs(out_bf16 - ref)))
    assert jnp.allclose(out_bf16, ref, atol=5e-2, rtol=5e-2), err_bf16

    print("KERNEL_OK")
</pallas_src>

<mosaic_0001>
module attributes {stable_mosaic.version = 11 : i64} {
  func.func @_sepconv_kernel(%arg0: i32, %arg1: i32, %arg2: memref<1x4x256xf32, #tpu.memory_space<vmem>>, %arg3: memref<8x4xf32, #tpu.memory_space<vmem>>, %arg4: memref<8x1xf32, #tpu.memory_space<vmem>>, %arg5: memref<1x8x256xf32, #tpu.memory_space<vmem>>) attributes {dimension_semantics = [#tpu.dimension_semantics<parallel>, #tpu.dimension_semantics<parallel>], iteration_bounds = array<i64: 2, 1>, scalar_prefetch = 0 : i64, scratch_operands = 0 : i64, tpu.core_type = #tpu.core_type<tc>, window_params = [{transform_indices = @transform_0, window_bounds = array<i64: 1, 4, 256>}, {pipeline_mode = #tpu.pipeline_mode<synchronous>, transform_indices = @transform_1, window_bounds = array<i64: 8, 4>}, {pipeline_mode = #tpu.pipeline_mode<synchronous>, transform_indices = @transform_2, window_bounds = array<i64: 8, 1>}, {transform_indices = @transform_3, window_bounds = array<i64: 1, 8, 256>}]} {
    %c0 = arith.constant 0 : index
    %c0_0 = arith.constant 0 : index
    %0 = vector.load %arg3[%c0, %c0_0] : memref<8x4xf32, #tpu.memory_space<vmem>>, vector<8x4xf32>
    %c0_1 = arith.constant 0 : index
    %c0_2 = arith.constant 0 : index
    %c0_3 = arith.constant 0 : index
    %1 = vector.load %arg2[%c0_1, %c0_2, %c0_3] : memref<1x4x256xf32, #tpu.memory_space<vmem>>, vector<1x4x256xf32>
    %2 = vector.shape_cast %1 : vector<1x4x256xf32> to vector<4x256xf32>
    %cst = arith.constant dense<0.000000e+00> : vector<8x256xf32>
    %3 = tpu.matmul %0, %2, %cst {dimension_numbers = #tpu.dot_dimension_numbers<[1], [0], [0], [1], [0, 0, 1, 1], [], []>} : vector<8x4xf32>, vector<4x256xf32>, vector<8x256xf32> -> vector<8x256xf32>
    %c0_4 = arith.constant 0 : index
    %c0_5 = arith.constant 0 : index
    %4 = vector.load %arg4[%c0_4, %c0_5] : memref<8x1xf32, #tpu.memory_space<vmem>>, vector<8x1xf32>
    %5 = vector.broadcast %4 : vector<8x1xf32> to vector<8x256xf32>
    %6 = arith.addf %3, %5 : vector<8x256xf32>
    %c0_6 = arith.constant 0 : index
    %c0_7 = arith.constant 0 : index
    %c0_8 = arith.constant 0 : index
    %7 = vector.load %arg5[%c0_6, %c0_7, %c0_8] : memref<1x8x256xf32, #tpu.memory_space<vmem>>, vector<1x8x256xf32>
    %8 = vector.shape_cast %7 : vector<1x8x256xf32> to vector<8x256xf32>
    %9 = vector.shape_cast %6 : vector<8x256xf32> to vector<1x8x256xf32>
    tpu.vector_store %arg5[%c0_6, %c0_7, %c0_8], %9 {strides = array<i32>} : memref<1x8x256xf32, #tpu.memory_space<vmem>>, vector<1x8x256xf32>,
    return
  }
  func.func @transform_0(%arg0: i32, %arg1: i32) -> (i32, i32, i32) {
    %c0_i32 = arith.constant 0 : i32
    %c0_i32_0 = arith.constant 0 : i32
    return %arg0, %c0_i32, %arg1 : i32, i32, i32
  }
  func.func @transform_1(%arg0: i32, %arg1: i32) -> (i32, i32) {
    %c0_i32 = arith.constant 0 : i32
    %c0_i32_0 = arith.constant 0 : i32
    %c0_i32_1 = arith.constant 0 : i32
    return %c0_i32, %c0_i32_0 : i32, i32
  }
  func.func @transform_2(%arg0: i32, %arg1: i32) -> (i32, i32) {
    %c0_i32 = arith.constant 0 : i32
    %c0_i32_0 = arith.constant 0 : i32
    %c0_i32_1 = arith.constant 0 : i32
    return %c0_i32, %c0_i32_0 : i32, i32
  }
  func.func @transform_3(%arg0: i32, %arg1: i32) -> (i32, i32, i32) {
    %c0_i32 = arith.constant 0 : i32
    %c0_i32_0 = arith.constant 0 : i32
    return %arg0, %c0_i32, %arg1 : i32, i32, i32
  }
}

</mosaic_0001>

<bundles_post_ra>
// kernel: separable_conv2d.1
= control target key start
LH: loop header
LB: loop body
LE: loop exit
PB: predicated region body
PF: predicated region fallthrough
CT: control target
= control target key end

     0   :  { %s448_s12 = smov 0   ;;  %s450_s13 = smov 0   ;;  %s487_s0 = inlined_call_operand.vmem [shape: f32[2,4,256], index: 0, kind: input, shape index: {}]   ;;  %s488_s1 = inlined_call_operand.vmem [shape: f32[8,4], index: 1, kind: input, shape index: {}]   ;;  %s489_s2 = inlined_call_operand.vmem [shape: f32[8,1], index: 2, kind: input, shape index: {}]   ;;  %s490_s3 = inlined_call_operand.vmem [shape: f32[2,8,256], index: 3, kind: output, shape index: {}]  }
   0x1   :  { %s452_s14 = smov 0  }
   0x2 LB: > { %s25_s15 = sadd.s32 1, %s421_s13  ;;  %p364_p0 = scmp.ge.s32.totalorder %s425_s14, 1  ;;  %s425_s14 = sphi %s452_s14, %s13_s14   ;;  %s421_s13 = sphi %s450_s13, %s492_s13   ;;  %s417_s12 = sphi %s448_s12, %s491_s12  }
   0x3   : > { %p27_p1 = scmp.ge.s32.totalorder %s25_s15, 2  ;;  %p158_p2 = scmp.lt.s32.totalorder %s425_s14, 3 }
   0x5   : > { %s494_s15 = smov (%p27_p1, %s25_s15), 0  ;;  %p159_p3 = pnand %p364_p0, %p158_p2 }
   0x6   : > { %p191_p4 = scmp.lt.s32.totalorder (!%p159_p3), %s417_s12, 1 }
   0x7   : > { %162 = sbr.rel (%p159_p3) target bundleno = 155 (0x9b), region = 32 }
   0xc   : > { %v212_v0 = vld [vmem:[%s489_s2] sm:$0xff]  ;;  %v427_v1 = vmov 0   ;;  %s496_s12 = smov (!%p191_p4, %s417_s12), 1  ;;  %vm226_vm0 = vcmask 1043456   ;;  %vm222_vm1 = vcmask 31744  }
   0xd   : > { %402 = vset.pattern.permute.xlu0 %v427_v1  ;;  %s375_s18 = sshll.u32 %s496_s12, 3  ;;  %v210_v3 = vld [vmem:[%s488_s1] sm:$0xff]  ;;  %s376_s24 = sshll.u32 %s496_s12, 4 }
   0xe   : > { %215 = vperm.xlu0 %402, %v212_v0   ;;  %s198_s21 = scalar_lea.vmem %s487_s0, %s375_s18  ;;  %s208_s27 = scalar_lea.vmem %s490_s3, %s376_s24 }
   0xf   : > { %v211_v2 = vld [vmem:[%s198_s21] sm:$0xff] }
  0x10   : > { %219 = vst [vmem:[#allocation1] ss:$2 sm:$0xff] %v211_v2 }
  0x17   : > { %v220_v4 = vld.sshfl [vmem:[#allocation1] sm:$0xff pattern:$0x75316420]  ;;  %v221_v5 = vld.sshfl [vmem:[#allocation1 + $0x8] sm:$0xff pattern:$0x75316420] }
  0x18   : > { %369 = vmatpush.msk.msra.mxu0 %vm226_vm0, %v220_v4  ;;  %371 = vmatpush.msk.msra.mxu1 %vm226_vm0, %v221_v5 }
  0x19   : > { %370 = vmatmul.msk.f32.vlgmr.msra.gmra.mxu0 %vm222_vm1, %v210_v3  ;;  %372 = vmatmul.msk.f32.vlgmr.msra.gmra.mxu1 %vm222_vm1, %v210_v3 }
  0x80   : > { %v216_v6 = vpop.permute.xlu0 %215 }
  0x96   : > { %v248_v7 = vpop.f32.mrf.mxu0  ;;  %v268_v8 = vpop.f32.mrf.mxu1 }
  0x97   : > { %v249_v9 = vadd.f32 %v248_v7, %v216_v6  ;;  %v269_v10 = vadd.f32 %v268_v8, %v216_v6 }
  0x99   : > { %271 = vst [vmem:[%s208_s27] sm:$0xff] %v249_v9 }
  0x9a   : > { %272 = vst [vmem:[%s208_s27 + $0x8] sm:$0xff] %v269_v10 }
  0x9b PF: > { %s13_s14 = sadd.s32 1, %s425_s14   ;;  %s491_s12 = smov %s421_s13 }
  0x9c   : > { %p10_p5 = scmp.ge.s32.totalorder %s13_s14, 4   ;;  %s492_s13 = smov %s494_s15 }
  0x9e   :  { %12 = sbr.rel (!%p10_p5) target bundleno = 2 (0x2), region = 62 }

</bundles_post_ra>
